<compile_context>
chip_gen: v7x
topology: tpu7x:2x2x1
jax: 0.10.0
libtpu: 0.0.40
codegen_flags: <defaults>
</compile_context>

<pallas_src>
import jax
import jax.numpy as jnp
from jax.experimental import pallas as pl
from jax.experimental.pallas import tpu as pltpu


def _round_up(x, m):
    return (x + m - 1) // m * m


def _matmul_bias_relu_kernel(p_ref, w_ref, b_ref, o_ref):
    """One im2col matmul block: (TM, Kpad) @ (Kpad, Cout) + bias, ReLU.

    p_ref: (TM, Kpad)     VMEM  (im2col patches, lane-dense contraction axis)
    w_ref: (Kpad, Cout)   VMEM  (reshaped conv weight)
    b_ref: (1, Cout)      VMEM
    o_ref: (TM, Cout)     VMEM  (lane-dense output, unmasked stores)
    """
    acc = jnp.dot(p_ref[...], w_ref[...], preferred_element_type=jnp.float32)
    acc = acc + b_ref[...]
    o_ref[...] = jnp.maximum(acc, 0.0).astype(o_ref.dtype)


def conv_layer_forward(x_nchw, w_oihw, bias, *, kernel_size=9,
                       out_layout="NHWC", use_bf16=False):
    """ConvLayer.forward: relu(conv2d(x, w, b, stride=1, padding=0)).

    x_nchw: (B, Cin, H, W) float32   (PyTorch NCHW input)
    w_oihw: (Cout, Cin, KH, KW) float32
    bias:   (Cout,) float32
    returns NHWC (B, OH, OW, Cout) by default; NCHW if out_layout="NCHW".
    """
    B, Cin, H, W = x_nchw.shape
    Cout = w_oihw.shape[0]
    KH = KW = kernel_size
    OH, OW = H - KH + 1, W - KW + 1
    K = KH * KW * Cin
    Kpad = _round_up(K, 128)

    # ---- im2col in the wrapper (data movement only; compute stays in-kernel)
    x_nhwc = jnp.transpose(x_nchw, (0, 2, 3, 1))                  # (B, H, W, Cin)
    taps = [x_nhwc[:, kh:kh + OH, kw:kw + OW, :]
            for kh in range(KH) for kw in range(KW)]              # (B, OH, OW, Cin) each
    patches = jnp.stack(taps, axis=3).reshape(B * OH * OW, K)     # row order (kh, kw, cin)

    # Weight OIHW -> (KH, KW, Cin, Cout) -> (K, Cout), matching patch ordering.
    w2 = jnp.transpose(w_oihw, (2, 3, 1, 0)).reshape(K, Cout)

    # ---- M tiling: fold batch into M; keep >= 2 parallel blocks for v7x's 2 TCs.
    M = B * OH * OW
    if M >= 256:
        TM = 128
    else:
        TM = max(8, _round_up(M, 16) // 2)    # two blocks when M is small
    Mpad = _round_up(M, TM)
    grid = Mpad // TM

    compute_dtype = jnp.bfloat16 if use_bf16 else jnp.float32
    patches_p = jnp.zeros((Mpad, Kpad), compute_dtype).at[:M, :K].set(
        patches.astype(compute_dtype))
    w_p = jnp.zeros((Kpad, Cout), compute_dtype).at[:K, :].set(
        w2.astype(compute_dtype))
    b2 = bias.reshape(1, Cout).astype(jnp.float32)

    flops = 2 * M * K * Cout
    bytes_accessed = (patches_p.size * patches_p.dtype.itemsize
                      + w_p.size * w_p.dtype.itemsize
                      + b2.size * 4
                      + Mpad * Cout * 4)

    out_flat = pl.pallas_call(
        _matmul_bias_relu_kernel,
        out_shape=jax.ShapeDtypeStruct((Mpad, Cout), x_nchw.dtype),
        grid=(grid,),
        in_specs=[
            pl.BlockSpec((TM, Kpad), lambda i: (i, 0)),
            pl.BlockSpec((Kpad, Cout), lambda i: (0, 0)),
            pl.BlockSpec((1, Cout), lambda i: (0, 0)),
        ],
        out_specs=pl.BlockSpec((TM, Cout), lambda i: (i, 0)),
        compiler_params=pltpu.CompilerParams(
            dimension_semantics=("parallel",),
        ),
        cost_estimate=pl.CostEstimate(
            flops=flops, transcendentals=0, bytes_accessed=bytes_accessed),
    )(patches_p, w_p, b2)

    out_nhwc = out_flat[:M].reshape(B, OH, OW, Cout)     # free row-major reshape
    if out_layout == "NHWC":
        return out_nhwc
    # PyTorch NCHW parity; note this transpose costs an extra HBM round-trip.
    return jnp.transpose(out_nhwc, (0, 3, 1, 2))


if __name__ == "__main__":
    key = jax.random.PRNGKey(0)
    k_x, k_w, k_b = jax.random.split(key, 3)

    # Shapes consistent with the module: in_channels=1, out_channels=256,
    # kernel_size=9, stride=1; spatial 16x16 -> output 8x8.
    B, Cin, H, W = 2, 1, 16, 16
    Cout, Ksz = 256, 9

    x = jax.random.normal(k_x, (B, Cin, H, W), dtype=jnp.float32)

    # Deterministic Conv2d-style init (uniform in +/- 1/sqrt(fan_in)).
    fan_in = Cin * Ksz * Ksz
    bound = 1.0 / (fan_in ** 0.5)
    w = jax.random.uniform(k_w, (Cout, Cin, Ksz, Ksz), jnp.float32, -bound, bound)
    b = jax.random.uniform(k_b, (Cout,), jnp.float32, -bound, bound)

    out = conv_layer_forward(x, w, b, kernel_size=Ksz)   # NHWC (canonical layout)
    out = jax.block_until_ready(out)

    # Sanity check against XLA's conv (same math as F.relu(conv(x))), in NHWC.
    ref = jax.lax.conv_general_dilated(
        jnp.transpose(x, (0, 2, 3, 1)), jnp.transpose(w, (2, 3, 1, 0)),
        window_strides=(1, 1), padding="VALID",
        dimension_numbers=("NHWC", "HWIO", "NHWC"),
    )
    ref = jnp.maximum(ref + b[None, None, None, :], 0.0)

    assert out.shape == (B, H - Ksz + 1, W - Ksz + 1, Cout)
    assert jnp.allclose(out, ref, atol=1e-4, rtol=1e-4)

    print("KERNEL_OK")
</pallas_src>

<mosaic_0001>
module attributes {stable_mosaic.version = 11 : i64} {
  func.func @_matmul_bias_relu_kernel(%arg0: i32, %arg1: memref<64x128xf32, #tpu.memory_space<vmem>>, %arg2: memref<128x256xf32, #tpu.memory_space<vmem>>, %arg3: memref<1x256xf32, #tpu.memory_space<vmem>>, %arg4: memref<64x256xf32, #tpu.memory_space<vmem>>) attributes {dimension_semantics = [#tpu.dimension_semantics<parallel>], iteration_bounds = array<i64: 2>, scalar_prefetch = 0 : i64, scratch_operands = 0 : i64, tpu.core_type = #tpu.core_type<tc>, window_params = [{transform_indices = @transform_0, window_bounds = array<i64: 64, 128>}, {pipeline_mode = #tpu.pipeline_mode<synchronous>, transform_indices = @transform_1, window_bounds = array<i64: 128, 256>}, {pipeline_mode = #tpu.pipeline_mode<synchronous>, transform_indices = @transform_2, window_bounds = array<i64: 1, 256>}, {transform_indices = @transform_3, window_bounds = array<i64: 64, 256>}]} {
    %c0 = arith.constant 0 : index
    %c0_0 = arith.constant 0 : index
    %0 = vector.load %arg1[%c0, %c0_0] : memref<64x128xf32, #tpu.memory_space<vmem>>, vector<64x128xf32>
    %c0_1 = arith.constant 0 : index
    %c0_2 = arith.constant 0 : index
    %1 = vector.load %arg2[%c0_1, %c0_2] : memref<128x256xf32, #tpu.memory_space<vmem>>, vector<128x256xf32>
    %cst = arith.constant dense<0.000000e+00> : vector<64x256xf32>
    %2 = tpu.matmul %0, %1, %cst {dimension_numbers = #tpu.dot_dimension_numbers<[1], [0], [0], [1], [0, 0, 1, 1], [], []>} : vector<64x128xf32>, vector<128x256xf32>, vector<64x256xf32> -> vector<64x256xf32>
    %c0_3 = arith.constant 0 : index
    %c0_4 = arith.constant 0 : index
    %3 = vector.load %arg3[%c0_3, %c0_4] : memref<1x256xf32, #tpu.memory_space<vmem>>, vector<1x256xf32>
    %4 = vector.broadcast %3 : vector<1x256xf32> to vector<64x256xf32>
    %5 = arith.addf %2, %4 : vector<64x256xf32>
    %cst_5 = arith.constant 0.000000e+00 : f32
    %6 = vector.broadcast %cst_5 : f32 to vector<64x256xf32>
    %7 = arith.maximumf %5, %6 : vector<64x256xf32>
    %c0_6 = arith.constant 0 : index
    %c0_7 = arith.constant 0 : index
    %8 = vector.load %arg4[%c0_6, %c0_7] : memref<64x256xf32, #tpu.memory_space<vmem>>, vector<64x256xf32>
    tpu.vector_store %arg4[%c0_6, %c0_7], %7 {strides = array<i32>} : memref<64x256xf32, #tpu.memory_space<vmem>>, vector<64x256xf32>,
    return
  }
  func.func @transform_0(%arg0: i32) -> (i32, i32) {
    %c0_i32 = arith.constant 0 : i32
    %c0_i32_0 = arith.constant 0 : i32
    return %arg0, %c0_i32 : i32, i32
  }
  func.func @transform_1(%arg0: i32) -> (i32, i32) {
    %c0_i32 = arith.constant 0 : i32
    %c0_i32_0 = arith.constant 0 : i32
    %c0_i32_1 = arith.constant 0 : i32
    return %c0_i32, %c0_i32_0 : i32, i32
  }
  func.func @transform_2(%arg0: i32) -> (i32, i32) {
    %c0_i32 = arith.constant 0 : i32
    %c0_i32_0 = arith.constant 0 : i32
    %c0_i32_1 = arith.constant 0 : i32
    return %c0_i32, %c0_i32_0 : i32, i32
  }
  func.func @transform_3(%arg0: i32) -> (i32, i32) {
    %c0_i32 = arith.constant 0 : i32
    %c0_i32_0 = arith.constant 0 : i32
    return %arg0, %c0_i32 : i32, i32
  }
}

</mosaic_0001>

<bundles_post_ra>
// kernel: tpu_custom_call.1
= control target key start
LH: loop header
LB: loop body
LE: loop exit
PB: predicated region body
PF: predicated region fallthrough
CT: control target
= control target key end

     0   :  { %8 = vsyncpa [#allocation3], 0  ;;  %s1035_s0 = inlined_call_operand.hbm [shape: f32[128,128], index: 0, kind: input, shape index: {}]   ;;  %s1036_s1 = inlined_call_operand.hbm [shape: f32[128,256], index: 1, kind: input, shape index: {}]   ;;  %s1037_s2 = inlined_call_operand.vmem [shape: f32[1,256], index: 2, kind: input, shape index: {}]   ;;  %s1038_s3 = inlined_call_operand.hbm [shape: f32[128,256], index: 3, kind: output, shape index: {}]  }
   0x1   :  { %10 = vsyncpa [#allocation3 + $0x1], 0 }
   0x2   :  { %11 = vsyncpa [#allocation6], 0 }
   0x3   :  { %12 = vsyncpa [#allocation4], 0 }
   0x4   :  { %14 = vsyncpa [#allocation4 + $0x1], 0  ;;  %s793_s12 = smov 0   ;;  %s795_s13 = smov 0  }
   0x5   :  { %s797_s14 = smov 0   ;;  %s799_s15 = smov 0  }
   0x6 LB: > { %s814_s16 = sadd.s32 4294967295, %s761_s15   ;;  %s501_s17 = sadd.s32 4294967294, %s761_s15   ;;  %s761_s15 = sphi %s799_s15, %s1058_s15   ;;  %s757_s14 = sphi %s797_s14, %s1057_s14   ;;  %s753_s13 = sphi %s795_s13, %s1056_s13   ;;  %s749_s12 = sphi %s793_s12, %s1055_s12  }
   0x7   : > { %p40_p0 = scmp.ne.s32.totalorder %s753_s13, %s749_s12  ;;  %p1039_p1 = scmp.eq.s32.totalorder %s814_s16, 0 }
   0x8   : > { %p112_p3 = scmp.eq.s32.totalorder %s501_s17, 1  ;;  %p502_p5 = scmp.ge.s32.totalorder %s761_s15, 1 }
   0x9   : > { %p823_p4 = por %p1039_p1, %p40_p0  ;;  %p119_p7 = scmp.lt.s32.totalorder %s761_s15, 3 }
   0xa   : > { %p828_p6 = por %p112_p3, %p40_p0  ;;  %s763_s21 = smov [#allocation5]  }
   0xb   : > { %s1042_s18 = scalar_select %p823_p4, 1, 0 }
   0xc   : > { %s1043_s19 = scalar_select %p828_p6, 1, 0 }
   0xd   : > { %p833_p8 = pnand %p502_p5, %p119_p7  ;;  %s131_s22 = sshll.u32 %s763_s21, 4  ;;  %s837_s22 = int_to_ptr.vmem [resolvable:$true] %s131_s22 }
   0xe   : > { %s849_s24 = sadd.s32 1, %s761_s15   ;;  %s27_s25 = sadd.s32 1, %s757_s14 }
   0xf   : > { %s1044_s20 = scalar_select %p833_p8, 1, 0 }
  0x10   : > { %p577_p9 = pneg %p833_p8  ;;  %s24_s26 = ssub.s32 %s761_s15, %s849_s24 }
  0x11   : > { %s633_s29 = scalar_lea.hbm %s1036_s1, 4096 }
  0x12   : > { %p844_p11 = pnand %p577_p9, %p1039_p1  ;;  %p634_p12 = scmp.ne.s32.totalorder %s1036_s1, %s633_s29 }
  0x13   : > { %p640_p5 = scmp.lt.u32.totalorder %s633_s29, %s1036_s1 }
  0x14   : > { %p635_p13 = pneg %p844_p11 }
  0x16   : > { %p636_p0 = pnand %p635_p13, %p634_p12 }
  0x18   : > { %p637_p3 = pneg %p636_p0 }
  0x1a   : > { %p642_p7 = pnand %p640_p5, %p637_p3 }
  0x1c   : > { %645 = shalt.err (!%p642_p7)
}
  0x1d   : > { %s646_s7 = scalar_lea.vmem %s837_s22, 4096  ;;  %p654_p2 = scmp.lt.s32.totalorder %s837_s22, %s837_s22 }
  0x1e   : > { %p647_p9 = scmp.ne.s32.totalorder %s837_s22, %s646_s7  ;;  %p655_p6 = scmp.lt.s32.totalorder %s646_s7, %s646_s7 }
  0x20   : > { %p649_p10 = pnand %p647_p9, %p635_p13  ;;  %p656_p4 = por %p655_p6, %p654_p2 }
  0x22   : > { %p650_p1 = pneg %p649_p10 }
  0x24   : > { %p657_p8 = pnand %p656_p4, %p650_p1 }
  0x26   : > { %660 = shalt.err (!%p657_p8)
}
  0x27   : > { %s764_s8 = smov 256   ;;  %s765_s9 = smov 16  }
  0x28   : > { %580 = dma.hbm_to_vmem [thread:$0]  (!%p844_p11), %s1036_s1, 4096, %s837_s22, [#allocation6], %s764_s8, %s764_s8, %s765_s9  }
  0x29   : > { %p25_p2 = scmp.eq.s32.totalorder %s24_s26, 0  ;;  %p34_p1 = scmp.ne.s32.totalorder %s757_s14, %s753_s13 }
  0x2a   : > { %p35_p4 = scmp.eq.s32.totalorder %s761_s15, 0  ;;  %p590_p6 = scmp.lt.s32.totalorder %s761_s15, 2 }
  0x2b   : > { %s880_s17 = scalar_select %p25_p2, %s757_s14, %s27_s25  }
  0x2c   : > { %p36_p8 = por %p35_p4, %p34_p1  ;;  %p1046_p10 = scmp.eq.s32.totalorder %s814_s16, 1 }
  0x2d   : > { %s148_s27 = sand.u32 1, %s757_s14   ;;  %s518_s28 = sshll.u32 %s761_s15, 10 }
  0x2e   : > { %p884_p12 = por %p1046_p10, %p34_p1  ;;  %s505_s29 = sshll.u32 %s148_s27, 6 }
  0x2f   : > { %s893_s4 = scalar_lea.hbm %s1035_s0, %s518_s28  ;;  %s152_s22 = scalar_lea.vmem [#allocation2], %s505_s29 }
  0x30   : > { %s159_s25 = sshll.u32 %s152_s22, 4  ;;  %p895_p11 = pnand %p590_p6, %p36_p8  ;;  %s899_s25 = int_to_ptr.vmem [resolvable:$true] %s159_s25 }
  0x31   : > { %s901_s5 = scalar_lea.sflag [#allocation3], %s148_s27  ;;  %s661_s6 = scalar_lea.hbm %s893_s4, 1024 }
  0x32   : > { %p662_p13 = scmp.ne.s32.totalorder %s893_s4, %s661_s6  ;;  %p663_p0 = pneg %p895_p11 }
  0x33   : > { %s666_s9 = scalar_lea.hbm %s1035_s0, 2048  ;;  %p667_p7 = scmp.lt.u32.totalorder %s893_s4, %s1035_s0 }
  0x34   : > { %p664_p3 = pnand %p663_p0, %p662_p13  ;;  %p668_p9 = scmp.lt.u32.totalorder %s666_s9, %s661_s6 }
  0x35   : > { %p670_p1 = scmp.lt.u32.totalorder %s661_s6, %s893_s4 }
  0x36   : > { %p665_p5 = pneg %p664_p3  ;;  %p669_p2 = por %p668_p9, %p667_p7 }
  0x38   : > { %p671_p4 = por %p670_p1, %p669_p2 }
  0x3a   : > { %p672_p6 = pnand %p671_p4, %p665_p5 }
  0x3c   : > { %675 = shalt.err (!%p672_p6)
}
  0x3d   : > { %s676_s27 = scalar_lea.vmem %s899_s25, 1024  ;;  %s766_s28 = smov [#allocation2]  }
  0x3e   : > { %p677_p8 = scmp.ne.s32.totalorder %s899_s25, %s676_s27  ;;  %s681_s29 = sshll.u32 %s766_s28, 4  ;;  %s682_s29 = int_to_ptr.vmem [resolvable:$false] %s681_s29 }
  0x3f   : > { %s683_s23 = scalar_lea.vmem %s682_s29, 2048  ;;  %p684_p3 = scmp.lt.s32.totalorder %s899_s25, %s682_s29 }
  0x40   : > { %p679_p10 = pnand %p677_p8, %p663_p0  ;;  %p685_p7 = scmp.lt.s32.totalorder %s683_s23, %s676_s27 }
  0x42   : > { %p680_p13 = pneg %p679_p10  ;;  %p686_p9 = por %p685_p7, %p684_p3 }
  0x44   : > { %p687_p2 = pnand %p686_p9, %p680_p13 }
  0x46   : > { %690 = shalt.err (!%p687_p2)
}
  0x47   : > { %s767_s30 = smov 128   ;;  %s768_s22 = smov 8  }
  0x48   : > { %584 = dma.hbm_to_vmem [thread:$0]  (!%p895_p11), %s893_s4, 1024, %s899_s25, %s901_s5, %s767_s30, %s767_s30, %s768_s22  }
  0x49   : > { %p1049_p0 = scmp.ne.s32.totalorder %s1044_s20, 0 }
  0x4a   : > { %s932_s6 = sand.u32 (!%p1049_p0), 1, %s753_s13   ;;  %p1050_p5 = scmp.ne.s32.totalorder (!%p1049_p0), %s1042_s18, 0 }
  0x4b   : > { %171 = sbr.rel (%p1049_p0) target bundleno = 365 (0x16d), region = 32  ;;  %s509_s7 = sshll.u32 (!%p1049_p0), %s932_s6, 6 }
  0x4c   : > { %s174_s8 = scalar_lea.sflag (!%p1049_p0), [#allocation3], %s932_s6  ;;  %s936_s9 = scalar_lea.vmem (!%p1049_p0), [#allocation2], %s509_s7 }
  0x52   : > { %736 = dma.done.wait (%p1050_p5), %s174_s8, 1024  }
  0x53   : > { %738 = vsyncadd (%p1050_p5), %s174_s8, 4294966272  ;;  %p1051_p11 = scmp.eq.s32.totalorder %s814_s16, 0 }
  0x55   : > { %740 = dma.done.wait (%p1051_p11), [#allocation6], 4096   ;;  %p1052_p1 = pmov %p1051_p11 }
  0x56   : > { %v769_v0 = vmov 0.0   ;;  %v215_v1 = vld [vmem:[#allocation5 + $0x8] sm:$0xff]  ;;  %v217_v2 = vld [vmem:[#allocation5 + $0x18] sm:$0xff]  ;;  %v214_v3 = vld [vmem:[#allocation5] sm:$0xff]  ;;  %v248_v57 = vlaneseq  ;;  %s511_s4 = sshll.u32 %s932_s6, 7  ;;  %s520_s26 = sshll.u32 %s814_s16, 11 }
  0x57   : > { %742 = vsyncadd (%p1052_p1), [#allocation6], 4294963200  ;;  %322 = vmatprep.mubr.f32.mxu0 %v769_v0  ;;  %346 = vmatprep.mubr.f32.mxu1 %v769_v0  ;;  %v521_v4 = vpack.c.bf16 %v217_v2, %v215_v1  ;;  %v216_v5 = vld [vmem:[#allocation5 + $0x10] sm:$0xff]  ;;  %v219_v6 = vld [vmem:[#allocation5 + $0x28] sm:$0xff]  ;;  %s966_s25 = scalar_lea.vmem [#allocation7], %s511_s4  ;;  %s985_s11 = scalar_lea.hbm %s1038_s3, %s520_s26 }
  0x58   : > { %v221_v7 = vld [vmem:[#allocation5 + $0x38] sm:$0xff]  ;;  %v523_v8 = vpack.c.bf16 %v216_v5, %v214_v3  ;;  %v218_v10 = vld [vmem:[#allocation5 + $0x20] sm:$0xff]  ;;  %v220_v11 = vld [vmem:[#allocation5 + $0x30] sm:$0xff]  ;;  %v249_v58 = vshrl.u32 %v248_v57, 7  ;;  %s418_s5 = sshll.u32 %s966_s25, 4  ;;  %s404_s27 = scalar_lea.sflag [#allocation4], %s932_s6  ;;  %s987_s5 = int_to_ptr.vmem [resolvable:$true] %s418_s5 }
  0x59   : > { %v525_v9 = vpack.c.bf16 %v221_v7, %v219_v6  ;;  %v223_v12 = vld [vmem:[#allocation5 + $0x48] sm:$0xff]  ;;  %522 = vmatprep.subr.bf16.mxu0 %v521_v4  ;;  %553 = vmatprep.subr.bf16.mxu1 %v521_v4  ;;  %v225_v13 = vld [vmem:[#allocation5 + $0x58] sm:$0xff]  ;;  %v527_v14 = vpack.c.bf16 %v220_v11, %v218_v10  ;;  %v222_v16 = vld [vmem:[#allocation5 + $0x40] sm:$0xff]  ;;  %s691_s28 = scalar_lea.vmem %s987_s5, 2048  ;;  %s770_s29 = smov [#allocation7]  }
  0x5a   : > { %524 = vmatpush1.bf16.msra.mxu0 %v523_v8  ;;  %561 = vmatpush1.bf16.msra.mxu1 %v523_v8  ;;  %v529_v15 = vpack.c.bf16 %v225_v13, %v223_v12  ;;  %v224_v17 = vld [vmem:[#allocation5 + $0x50] sm:$0xff]  ;;  %v227_v18 = vld [vmem:[#allocation5 + $0x68] sm:$0xff]  ;;  %v229_v19 = vld [vmem:[#allocation5 + $0x78] sm:$0xff]  ;;  %v250_v59 = vsub.s32 0, %v249_v58  ;;  %v254_v61 = vsub.s32 1, %v249_v58  ;;  %p692_p4 = scmp.ne.s32.totalorder %s987_s5, %s691_s28  ;;  %s695_s23 = sshll.u32 %s770_s29, 4  ;;  %s696_s23 = int_to_ptr.vmem [resolvable:$false] %s695_s23 }
  0x5b   : > { %526 = vmatprep.subr.bf16.mxu0 %v525_v9  ;;  %554 = vmatprep.subr.bf16.mxu1 %v525_v9  ;;  %v531_v20 = vpack.c.bf16 %v224_v17, %v222_v16  ;;  %v533_v21 = vpack.c.bf16 %v229_v19, %v227_v18  ;;  %v226_v22 = vld [vmem:[#allocation5 + $0x60] sm:$0xff]  ;;  %v228_v23 = vld [vmem:[#allocation5 + $0x70] sm:$0xff]  ;;  %v231_v24 = vld [vmem:[#allocation5 + $0x88] sm:$0xff]  ;;  %s697_s30 = scalar_lea.vmem %s696_s23, 4096  ;;  %p698_p10 = scmp.lt.s32.totalorder %s987_s5, %s696_s23 }
  0x5c   : > { %v233_v25 = vld [vmem:[#allocation5 + $0x98] sm:$0xff]  ;;  %v535_v26 = vpack.c.bf16 %v228_v23, %v226_v22  ;;  %v230_v28 = vld [vmem:[#allocation5 + $0x80] sm:$0xff]  ;;  %v232_v29 = vld [vmem:[#allocation5 + $0x90] sm:$0xff]  ;;  %p693_p6 = pnand %p692_p4, %p884_p12  ;;  %p699_p13 = scmp.lt.s32.totalorder %s697_s30, %s691_s28 }
  0x5d   : > { %v537_v27 = vpack.c.bf16 %v233_v25, %v231_v24  ;;  %v235_v30 = vld [vmem:[#allocation5 + $0xa8] sm:$0xff]  ;;  %v237_v31 = vld [vmem:[#allocation5 + $0xb8] sm:$0xff]  ;;  %v539_v32 = vpack.c.bf16 %v232_v29, %v230_v28  ;;  %v234_v34 = vld [vmem:[#allocation5 + $0xa0] sm:$0xff] }
  0x5e   : > { %528 = vmatpush1.bf16.msra.mxu0 %v527_v14  ;;  %562 = vmatpush1.bf16.msra.mxu1 %v527_v14  ;;  %v541_v33 = vpack.c.bf16 %v237_v31, %v235_v30  ;;  %v236_v35 = vld [vmem:[#allocation5 + $0xb0] sm:$0xff]  ;;  %v239_v36 = vld [vmem:[#allocation5 + $0xc8] sm:$0xff]  ;;  %v241_v37 = vld [vmem:[#allocation5 + $0xd8] sm:$0xff]  ;;  %p694_p8 = pneg %p693_p6  ;;  %p700_p3 = por %p699_p13, %p698_p10 }
  0x5f   : > { %530 = vmatprep.subr.bf16.mxu0 %v529_v15  ;;  %555 = vmatprep.subr.bf16.mxu1 %v529_v15  ;;  %v543_v38 = vpack.c.bf16 %v236_v35, %v234_v34  ;;  %v545_v39 = vpack.c.bf16 %v241_v37, %v239_v36  ;;  %v238_v40 = vld [vmem:[#allocation5 + $0xc0] sm:$0xff]  ;;  %v240_v41 = vld [vmem:[#allocation5 + $0xd0] sm:$0xff]  ;;  %v243_v42 = vld [vmem:[#allocation5 + $0xe8] sm:$0xff] }
  0x60   : > { %v245_v43 = vld [vmem:[#allocation5 + $0xf8] sm:$0xff]  ;;  %v547_v44 = vpack.c.bf16 %v240_v41, %v238_v40  ;;  %v242_v46 = vld [vmem:[#allocation5 + $0xe0] sm:$0xff]  ;;  %v244_v47 = vld [vmem:[#allocation5 + $0xf0] sm:$0xff]  ;;  %p701_p7 = pnand %p700_p3, %p694_p8 }
  0x61   : > { %v549_v45 = vpack.c.bf16 %v245_v43, %v243_v42  ;;  %v551_v48 = vpack.c.bf16 %v244_v47, %v242_v46  ;;  %v206_v49 = vld [vmem:[%s936_s9] sm:$0xff]  ;;  %v207_v51 = vld [vmem:[%s936_s9 + $0x8] sm:$0xff]  ;;  %v208_v53 = vld [vmem:[%s936_s9 + $0x10] sm:$0xff] }
  0x62   : > { %532 = vmatpush1.bf16.msra.mxu0 %v531_v20  ;;  %563 = vmatpush1.bf16.msra.mxu1 %v531_v20  ;;  %v210_v50 = vld [vmem:[%s936_s9 + $0x20] sm:$0xff]  ;;  %v211_v52 = vld [vmem:[%s936_s9 + $0x28] sm:$0xff]  ;;  %v212_v54 = vld [vmem:[%s936_s9 + $0x30] sm:$0xff] }
  0x63   : > { %534 = vmatprep.subr.bf16.mxu0 %v533_v21  ;;  %556 = vmatprep.subr.bf16.mxu1 %v533_v21  ;;  %v209_v55 = vld [vmem:[%s936_s9 + $0x18] sm:$0xff]  ;;  %v246_v60 = vld [vmem:[%s1037_s2] sm:$0x3] }
  0x64   : > { %v213_v56 = vld [vmem:[%s936_s9 + $0x38] sm:$0xff]  ;;  %v251_v62 = vrot.slane %v246_v60, %v250_v59  ;;  %v255_v63 = vrot.slane %v246_v60, %v254_v61 }
  0x66   : > { %536 = vmatpush1.bf16.msra.mxu0 %v535_v26  ;;  %564 = vmatpush1.bf16.msra.mxu1 %v535_v26 }
  0x67   : > { %538 = vmatprep.subr.bf16.mxu0 %v537_v27  ;;  %557 = vmatprep.subr.bf16.mxu1 %v537_v27 }
  0x6a   : > { %540 = vmatpush1.bf16.msra.mxu0 %v539_v32  ;;  %565 = vmatpush1.bf16.msra.mxu1 %v539_v32 }
  0x6b   : > { %542 = vmatprep.subr.bf16.mxu0 %v541_v33  ;;  %558 = vmatprep.subr.bf16.mxu1 %v541_v33 }
  0x6e   : > { %544 = vmatpush1.bf16.msra.mxu0 %v543_v38  ;;  %566 = vmatpush1.bf16.msra.mxu1 %v543_v38 }
  0x6f   : > { %546 = vmatprep.subr.bf16.mxu0 %v545_v39  ;;  %559 = vmatprep.subr.bf16.mxu1 %v545_v39 }
  0x72   : > { %548 = vmatpush1.bf16.msra.mxu0 %v547_v44  ;;  %567 = vmatpush1.bf16.msra.mxu1 %v547_v44 }
  0x73   : > { %550 = vmatprep.subr.bf16.mxu0 %v549_v45  ;;  %560 = vmatprep.subr.bf16.mxu1 %v549_v45 }
  0x76   : > { %552 = vmatpush1.bf16.msra.mxu0 %v551_v48  ;;  %568 = vmatpush1.bf16.msra.mxu1 %v551_v48 }
  0x79   : > { %323 = vmatmul.mubr.f32.vlgmr.msra.gmra.mrb[0].mxu0 %v206_v49  ;;  %347 = vmatmul.mubr.f32.vlgmr.msra.gmra.mrb[0].mxu1 %v210_v50 }
  0x7a   : > { %328 = vmatprep.mubr.f32.mxu0 %v769_v0  ;;  %352 = vmatprep.mubr.f32.mxu1 %v769_v0 }
  0x7d   : > { %329 = vmatmul.mubr.f32.gmra.mrb[2].mxu0 %v207_v51  ;;  %353 = vmatmul.mubr.f32.gmra.mrb[2].mxu1 %v211_v52 }
  0x7e   : > { %334 = vmatprep.mubr.f32.mxu0 %v769_v0  ;;  %358 = vmatprep.mubr.f32.mxu1 %v769_v0 }
  0x81   : > { %335 = vmatmul.mubr.f32.gmra.mrb[4].mxu0 %v208_v53  ;;  %359 = vmatmul.mubr.f32.gmra.mrb[4].mxu1 %v212_v54 }
  0x82   : > { %340 = vmatprep.mubr.f32.mxu0 %v769_v0  ;;  %364 = vmatprep.mubr.f32.mxu1 %v769_v0 }
  0x85   : > { %341 = vmatmul.mubr.f32.gmra.mrb[6].mxu0 %v209_v55  ;;  %365 = vmatmul.mubr.f32.gmra.mrb[6].mxu1 %v213_v56 }
 0x14c   : > { %v324_v1 = vpop.f32.mrb[0].mxu0  ;;  %v348_v2 = vpop.f32.mrb[0].mxu1 }
 0x14d   : > { %v325_v3 = vadd.f32 %v324_v1, %v251_v62  ;;  %v349_v4 = vadd.f32 %v348_v2, %v251_v62  ;;  %v326_v0 = vpop.f32.mrb[1].mxu0  ;;  %v350_v5 = vpop.f32.mrb[1].mxu1 }
 0x14e   : > { %v327_v6 = vadd.f32 %v326_v0, %v255_v63  ;;  %v351_v7 = vadd.f32 %v350_v5, %v255_v63 }
 0x14f   : > { %v371_v8 = vmax.f32 %v325_v3, 0.0  ;;  %v379_v9 = vmax.f32 %v349_v4, 0.0 }
 0x150   : > { %v372_v10 = vmax.f32 %v327_v6, 0.0  ;;  %v380_v11 = vmax.f32 %v351_v7, 0.0  ;;  %v330_v12 = vpop.f32.mrb[2].mxu0  ;;  %v354_v13 = vpop.f32.mrb[2].mxu1 }
 0x151   : > { %387 = vst [vmem:[%s966_s25] sm:$0xff] %v371_v8  ;;  %395 = vst [vmem:[%s966_s25 + $0x40] sm:$0xff] %v379_v9  ;;  %v331_v14 = vadd.f32 %v330_v12, %v251_v62  ;;  %v355_v15 = vadd.f32 %v354_v13, %v251_v62  ;;  %v332_v16 = vpop.f32.mrb[3].mxu0  ;;  %v356_v17 = vpop.f32.mrb[3].mxu1 }
 0x152   : > { %388 = vst [vmem:[%s966_s25 + $0x8] sm:$0xff] %v372_v10  ;;  %396 = vst [vmem:[%s966_s25 + $0x48] sm:$0xff] %v380_v11  ;;  %v333_v18 = vadd.f32 %v332_v16, %v255_v63  ;;  %v357_v19 = vadd.f32 %v356_v17, %v255_v63 }
 0x153   : > { %v373_v20 = vmax.f32 %v331_v14, 0.0  ;;  %v381_v21 = vmax.f32 %v355_v15, 0.0 }
 0x154   : > { %v374_v22 = vmax.f32 %v333_v18, 0.0  ;;  %v382_v23 = vmax.f32 %v357_v19, 0.0  ;;  %v336_v24 = vpop.f32.mrb[4].mxu0  ;;  %v360_v25 = vpop.f32.mrb[4].mxu1 }
 0x155   : > { %389 = vst [vmem:[%s966_s25 + $0x10] sm:$0xff] %v373_v20  ;;  %397 = vst [vmem:[%s966_s25 + $0x50] sm:$0xff] %v381_v21  ;;  %v337_v26 = vadd.f32 %v336_v24, %v251_v62  ;;  %v361_v27 = vadd.f32 %v360_v25, %v251_v62  ;;  %v338_v28 = vpop.f32.mrb[5].mxu0  ;;  %v362_v29 = vpop.f32.mrb[5].mxu1 }
 0x156   : > { %390 = vst [vmem:[%s966_s25 + $0x18] sm:$0xff] %v374_v22  ;;  %398 = vst [vmem:[%s966_s25 + $0x58] sm:$0xff] %v382_v23  ;;  %v339_v30 = vadd.f32 %v338_v28, %v255_v63  ;;  %v363_v31 = vadd.f32 %v362_v29, %v255_v63 }
 0x157   : > { %v375_v32 = vmax.f32 %v337_v26, 0.0  ;;  %v383_v33 = vmax.f32 %v361_v27, 0.0 }
 0x158   : > { %v376_v34 = vmax.f32 %v339_v30, 0.0  ;;  %v384_v35 = vmax.f32 %v363_v31, 0.0  ;;  %v342_v36 = vpop.f32.mrb[6].mxu0  ;;  %v366_v37 = vpop.f32.mrb[6].mxu1 }
 0x159   : > { %391 = vst [vmem:[%s966_s25 + $0x20] sm:$0xff] %v375_v32  ;;  %399 = vst [vmem:[%s966_s25 + $0x60] sm:$0xff] %v383_v33  ;;  %v343_v38 = vadd.f32 %v342_v36, %v251_v62  ;;  %v367_v39 = vadd.f32 %v366_v37, %v251_v62  ;;  %v344_v40 = vpop.f32.mrb[7].mxu0  ;;  %v368_v41 = vpop.f32.mrb[7].mxu1 }
 0x15a   : > { %392 = vst [vmem:[%s966_s25 + $0x28] sm:$0xff] %v376_v34  ;;  %400 = vst [vmem:[%s966_s25 + $0x68] sm:$0xff] %v384_v35  ;;  %v345_v42 = vadd.f32 %v344_v40, %v255_v63  ;;  %v369_v43 = vadd.f32 %v368_v41, %v255_v63 }
 0x15b   : > { %v377_v44 = vmax.f32 %v343_v38, 0.0  ;;  %v385_v45 = vmax.f32 %v367_v39, 0.0 }
 0x15c   : > { %v378_v46 = vmax.f32 %v345_v42, 0.0  ;;  %v386_v47 = vmax.f32 %v369_v43, 0.0 }
 0x15d   : > { %393 = vst [vmem:[%s966_s25 + $0x30] sm:$0xff] %v377_v44  ;;  %401 = vst [vmem:[%s966_s25 + $0x70] sm:$0xff] %v385_v45 }
 0x15e   : > { %394 = vst [vmem:[%s966_s25 + $0x38] sm:$0xff] %v378_v46  ;;  %402 = vst [vmem:[%s966_s25 + $0x78] sm:$0xff] %v386_v47 }
 0x15f   : > { %704 = shalt.err (!%p701_p7)
}
 0x160   : > { %s705_s22 = scalar_lea.hbm %s985_s11, 2048  ;;  %s709_s9 = scalar_lea.hbm %s1038_s3, 4096 }
 0x161   : > { %p706_p9 = scmp.ne.s32.totalorder %s985_s11, %s705_s22  ;;  %p710_p5 = scmp.lt.u32.totalorder %s985_s11, %s1038_s3 }
 0x162   : > { %p711_p11 = scmp.lt.u32.totalorder %s709_s9, %s705_s22  ;;  %p713_p4 = scmp.lt.u32.totalorder %s705_s22, %s985_s11 }
 0x163   : > { %p707_p2 = pnand %p706_p9, %p884_p12 }
 0x164   : > { %p712_p1 = por %p711_p11, %p710_p5 }
 0x165   : > { %p708_p0 = pneg %p707_p2 }
 0x166   : > { %p714_p6 = por %p713_p4, %p712_p1 }
 0x168   : > { %p715_p8 = pnand %p714_p6, %p708_p0 }
 0x16a   : > { %718 = shalt.err (!%p715_p8)
}
 0x16b   : > { %s771_s4 = smov 256   ;;  %s772_s25 = smov 16  }
 0x16c   : > { %575 = dma.vmem_to_hbm [thread:$0]  (%p884_p12), %s987_s5, 2048, %s985_s11, %s404_s27, %s771_s4, %s771_s4, %s772_s25  }
 0x16d PF: > { %s433_s26 = sand.u32 1, %s749_s12   ;;  %p1053_p10 = scmp.ne.s32.totalorder %s1043_s19, 0 }
 0x16e   : > { %p1054_p13 = scmp.ge.s32.totalorder %s761_s15, 2  ;;  %s434_s16 = scalar_lea.sflag [#allocation4], %s433_s26 }
 0x170   : > { %p586_p3 = pnand %p1054_p13, %p1053_p10 }
 0x172   : > { %744 = dma.done.wait (!%p586_p3), %s434_s16, 2048  }
 0x173   : > { %746 = vsyncadd (!%p586_p3), %s434_s16, 4294965248  ;;  %p17_p7 = scmp.ge.s32.totalorder %s849_s24, 4   ;;  %s1055_s12 = smov %s753_s13 }
 0x174   : > { %s1056_s13 = smov %s757_s14  ;;  %s1057_s14 = smov %s880_s17 }
 0x175   : > { %s1058_s15 = smov %s849_s24  ;;  %19 = sbr.rel (!%p17_p7) target bundleno = 6 (0x6), region = 81 }
 0x17c   :  { %439 = vsyncpa [#allocation3], 1 }
 0x17d   :  { %441 = vsyncpa [#allocation3 + $0x1], 1 }
 0x17e   :  { %442 = vsyncpa [#allocation6], 1 }
 0x17f   :  { %443 = vsyncpa [#allocation4], 1 }
 0x180   :  { %445 = vsyncpa [#allocation4 + $0x1], 1 }

</bundles_post_ra>
